<compile_context>
chip_gen: v6e
topology: v6e:2x2x1
jax: 0.10.0
libtpu: 0.0.40
codegen_flags: <defaults>
</compile_context>

<pallas_src>
import jax
import jax.numpy as jnp
from jax.experimental import pallas as pl
from jax.experimental.pallas import tpu as pltpu

LANE = 128


def _round_up(n, m):
    return ((n + m - 1) // m) * m


def _pad_to(x, shape):
    pads = [(0, t - s) for s, t in zip(x.shape, shape)]
    if not any(p for _, p in pads):
        return x
    return jnp.pad(x, pads)


def _encdec_kernel(enc_ref, dec_ref, avg_ref, exp_ref,
                   we1_ref, be1_ref, wsc_ref, bsc_ref,
                   wd1x_ref, bd1_ref, wd2_ref, bd2_ref,
                   out_ref):
    # ---- encoder layer 1: (BM*T_enc, Dep) @ (Dep, Hp), bf16 in / f32 acc (MXU)
    h1 = jnp.dot(enc_ref[...], we1_ref[...],
                 preferred_element_type=jnp.float32)
    h1 = jnp.maximum(h1 + be1_ref[...], 0.0)            # f32 VPU (v5e-safe)

    # ---- decoder.init_state: per-batch temporal mean as a block-diagonal
    #      averaging matmul (rides the MXU instead of an XLU cross-sublane reduce)
    m = jnp.dot(avg_ref[...], h1, preferred_element_type=jnp.float32)   # (BMp, Hp)

    # ---- state @ Wd1c, with the encoder's 2nd linear folded on the host:
    #      state = mean_t(h1) @ We2 + be2
    #      state @ Wd1c = mean_t(h1) @ (We2 @ Wd1c) + be2 @ Wd1c = m @ Wsc + bsc
    sc = jnp.dot(m, wsc_ref[...], preferred_element_type=jnp.float32) + bsc_ref[...]

    # ---- broadcast the per-batch state term over decoder time via an
    #      expansion matmul (MXU), giving (BM*T_dec, Hp)
    sc_full = jnp.dot(exp_ref[...], sc, preferred_element_type=jnp.float32)

    # ---- decoder layer 1: [dec_X ; state] @ Wd1 == dec_X @ Wd1x + state @ Wd1c
    d1 = jnp.dot(dec_ref[...], wd1x_ref[...],
                 preferred_element_type=jnp.float32)
    d1 = jnp.maximum(d1 + sc_full + bd1_ref[...], 0.0)

    # ---- decoder layer 2: output last dim is a multiple of 128 -> plain vst
    out = jnp.dot(d1.astype(wd2_ref.dtype), wd2_ref[...],
                  preferred_element_type=jnp.float32) + bd2_ref[...]
    out_ref[...] = out.astype(out_ref.dtype)


def encoder_decoder_forward(enc_x, dec_x, params, *, mxu_dtype=jnp.bfloat16):
    B, T_enc, D_enc = enc_x.shape
    Bd, T_dec, D_dec = dec_x.shape
    assert B == Bd
    H = params["we1"].shape[1]
    O = params["wd2"].shape[1]

    # ---- lane-dense padding of every feature axis (multiples of 128) ---------
    Dep, Ddp = _round_up(D_enc, LANE), _round_up(D_dec, LANE)
    Hp, Op = _round_up(H, LANE), _round_up(O, LANE)

    # Large matmul operands stored/consumed as bf16 (f32 MXU accumulation);
    # small state-path matrices and biases stay f32.
    we1 = _pad_to(params["we1"], (Dep, Hp)).astype(mxu_dtype)
    be1 = _pad_to(params["be1"], (1, Hp)).astype(jnp.float32)
    we2 = _pad_to(params["we2"], (Hp, Hp)).astype(jnp.float32)
    be2 = _pad_to(params["be2"], (1, Hp)).astype(jnp.float32)
    wd1x = _pad_to(params["wd1x"], (Ddp, Hp)).astype(mxu_dtype)
    wd1c = _pad_to(params["wd1c"], (Hp, Hp)).astype(jnp.float32)
    bd1 = _pad_to(params["bd1"], (1, Hp)).astype(jnp.float32)
    wd2 = _pad_to(params["wd2"], (Hp, Op)).astype(mxu_dtype)
    bd2 = _pad_to(params["bd2"], (1, Op)).astype(jnp.float32)

    # Host-side fold of encoder-linear-2 into the decoder state matmul.
    wsc = jnp.dot(we2, wd1c)          # (Hp, Hp)
    bsc = jnp.dot(be2, wd1c)          # (1, Hp)

    # ---- batch tiling: aim for >=128 MXU rows per grid step ------------------
    rows = max(1, min(T_enc, T_dec))
    BM = max(1, min(B, max(1, LANE // rows)))
    if (BM * T_enc) % 8 or (BM * T_dec) % 8:
        BM = B                        # block == full array -> alignment exempt
    B_pad = _round_up(B, BM)
    grid = B_pad // BM

    enc_p = _pad_to(enc_x.astype(mxu_dtype),
                    (B_pad, T_enc, Dep)).reshape(B_pad * T_enc, Dep)
    dec_p = _pad_to(dec_x.astype(mxu_dtype),
                    (B_pad, T_dec, Ddp)).reshape(B_pad * T_dec, Ddp)

    # Per-tile constant matrices (same for every grid step).  Sublane dims padded
    # to >=8 so every small matmul operand is tile-friendly.
    BMp = _round_up(BM, 8)
    avg = jnp.where(
        jnp.arange(BMp)[:, None] == (jnp.arange(BM * T_enc)[None, :] // T_enc),
        jnp.float32(1.0 / T_enc), jnp.float32(0.0))            # (BMp, BM*T_enc)
    expand = (
        (jnp.arange(BM * T_dec)[:, None] // T_dec)
        == jnp.arange(BMp)[None, :]).astype(jnp.float32)       # (BM*T_dec, BMp)

    full = lambda a: pl.BlockSpec(a.shape, lambda i: (0,) * a.ndim)

    cost = pl.CostEstimate(
        flops=int(2 * B_pad * (T_enc * Dep * Hp + Hp * Hp
                               + T_dec * (Ddp * Hp + Hp * Op))),
        transcendentals=0,
        bytes_accessed=int(
            enc_p.size * enc_p.dtype.itemsize
            + dec_p.size * dec_p.dtype.itemsize
            + sum(w.size * w.dtype.itemsize
                  for w in (we1, be1, wsc, bsc, wd1x, bd1, wd2, bd2, avg, expand))
            + B_pad * T_dec * Op * 4))

    out_flat = pl.pallas_call(
        _encdec_kernel,
        out_shape=jax.ShapeDtypeStruct((B_pad * T_dec, Op), jnp.float32),
        grid=(grid,),
        in_specs=[
            pl.BlockSpec((BM * T_enc, Dep), lambda i: (i, 0)),
            pl.BlockSpec((BM * T_dec, Ddp), lambda i: (i, 0)),
            full(avg), full(expand),
            full(we1), full(be1), full(wsc), full(bsc),
            full(wd1x), full(bd1), full(wd2), full(bd2),
        ],
        out_specs=pl.BlockSpec((BM * T_dec, Op), lambda i: (i, 0)),
        compiler_params=pltpu.CompilerParams(
            dimension_semantics=("parallel",)),
        cost_estimate=cost,
    )(enc_p, dec_p, avg, expand, we1, be1, wsc, bsc, wd1x, bd1, wd2, bd2)

    return out_flat.reshape(B_pad, T_dec, Op)[:B, :, :O]


def _reference(enc_x, dec_x, p):
    """Pure-JAX f32 reference of the concretized EncoderDecoder forward."""
    h1 = jnp.maximum(jnp.einsum("btd,dh->bth", enc_x, p["we1"]) + p["be1"], 0.0)
    enc_out = jnp.einsum("bth,hk->btk", h1, p["we2"]) + p["be2"]
    state = jnp.mean(enc_out, axis=1, keepdims=True)                  # (B,1,H)
    d1 = jnp.maximum(
        jnp.einsum("btd,dh->bth", dec_x, p["wd1x"])
        + jnp.einsum("bsh,hk->bsk", state, p["wd1c"])
        + p["bd1"], 0.0)
    return jnp.einsum("bth,ho->bto", d1, p["wd2"]) + p["bd2"]


if __name__ == "__main__":
    B, T_ENC, T_DEC = 2, 8, 8
    D_ENC, D_DEC, H, O = 32, 32, 32, 32

    key = jax.random.PRNGKey(0)
    ks = jax.random.split(key, 11)

    params = {
        "we1":  jax.random.normal(ks[0], (D_ENC, H), jnp.float32) * 0.1,
        "be1":  jax.random.normal(ks[1], (1, H), jnp.float32) * 0.1,
        "we2":  jax.random.normal(ks[2], (H, H), jnp.float32) * 0.1,
        "be2":  jax.random.normal(ks[3], (1, H), jnp.float32) * 0.1,
        "wd1x": jax.random.normal(ks[4], (D_DEC, H), jnp.float32) * 0.1,
        "wd1c": jax.random.normal(ks[5], (H, H), jnp.float32) * 0.1,
        "bd1":  jax.random.normal(ks[6], (1, H), jnp.float32) * 0.1,
        "wd2":  jax.random.normal(ks[7], (H, O), jnp.float32) * 0.1,
        "bd2":  jax.random.normal(ks[8], (1, O), jnp.float32) * 0.1,
    }

    enc_x = jax.random.normal(ks[9], (B, T_ENC, D_ENC), jnp.float32)
    dec_x = jax.random.normal(ks[10], (B, T_DEC, D_DEC), jnp.float32)

    out = encoder_decoder_forward(enc_x, dec_x, params)
    jax.block_until_ready(out)
    assert out.shape == (B, T_DEC, O)

    # Reference computed in f32 from the same bf16-rounded MXU operands the
    # kernel stores at rest, so only intermediate rounding differs.
    r16 = lambda x: x.astype(jnp.bfloat16).astype(jnp.float32)
    ref_params = dict(params)
    for k in ("we1", "wd1x", "wd2"):
        ref_params[k] = r16(params[k])
    ref = _reference(r16(enc_x), r16(dec_x), ref_params)

    assert jnp.allclose(out, ref, atol=2e-2, rtol=2e-2), float(
        jnp.max(jnp.abs(out - ref)))

    print("KERNEL_OK")
</pallas_src>

<mosaic_0001>
module attributes {stable_mosaic.version = 11 : i64} {
  func.func @_encdec_kernel(%arg0: i32, %arg1: memref<16x128xbf16, #tpu.memory_space<vmem>>, %arg2: memref<16x128xbf16, #tpu.memory_space<vmem>>, %arg3: memref<8x16xf32, #tpu.memory_space<vmem>>, %arg4: memref<16x8xf32, #tpu.memory_space<vmem>>, %arg5: memref<128x128xbf16, #tpu.memory_space<vmem>>, %arg6: memref<1x128xf32, #tpu.memory_space<vmem>>, %arg7: memref<128x128xf32, #tpu.memory_space<vmem>>, %arg8: memref<1x128xf32, #tpu.memory_space<vmem>>, %arg9: memref<128x128xbf16, #tpu.memory_space<vmem>>, %arg10: memref<1x128xf32, #tpu.memory_space<vmem>>, %arg11: memref<128x128xbf16, #tpu.memory_space<vmem>>, %arg12: memref<1x128xf32, #tpu.memory_space<vmem>>, %arg13: memref<16x128xf32, #tpu.memory_space<vmem>>) attributes {dimension_semantics = [#tpu.dimension_semantics<parallel>], iteration_bounds = array<i64: 1>, scalar_prefetch = 0 : i64, scratch_operands = 0 : i64, tpu.core_type = #tpu.core_type<tc>, window_params = [{transform_indices = @transform_0, window_bounds = array<i64: 16, 128>}, {transform_indices = @transform_1, window_bounds = array<i64: 16, 128>}, {pipeline_mode = #tpu.pipeline_mode<synchronous>, transform_indices = @transform_2, window_bounds = array<i64: 8, 16>}, {pipeline_mode = #tpu.pipeline_mode<synchronous>, transform_indices = @transform_3, window_bounds = array<i64: 16, 8>}, {pipeline_mode = #tpu.pipeline_mode<synchronous>, transform_indices = @transform_4, window_bounds = array<i64: 128, 128>}, {pipeline_mode = #tpu.pipeline_mode<synchronous>, transform_indices = @transform_5, window_bounds = array<i64: 1, 128>}, {pipeline_mode = #tpu.pipeline_mode<synchronous>, transform_indices = @transform_6, window_bounds = array<i64: 128, 128>}, {pipeline_mode = #tpu.pipeline_mode<synchronous>, transform_indices = @transform_7, window_bounds = array<i64: 1, 128>}, {pipeline_mode = #tpu.pipeline_mode<synchronous>, transform_indices = @transform_8, window_bounds = array<i64: 128, 128>}, {pipeline_mode = #tpu.pipeline_mode<synchronous>, transform_indices = @transform_9, window_bounds = array<i64: 1, 128>}, {pipeline_mode = #tpu.pipeline_mode<synchronous>, transform_indices = @transform_10, window_bounds = array<i64: 128, 128>}, {pipeline_mode = #tpu.pipeline_mode<synchronous>, transform_indices = @transform_11, window_bounds = array<i64: 1, 128>}, {transform_indices = @transform_12, window_bounds = array<i64: 16, 128>}]} {
    %c0 = arith.constant 0 : index
    %c0_0 = arith.constant 0 : index
    %0 = vector.load %arg1[%c0, %c0_0] : memref<16x128xbf16, #tpu.memory_space<vmem>>, vector<16x128xbf16>
    %c0_1 = arith.constant 0 : index
    %c0_2 = arith.constant 0 : index
    %1 = vector.load %arg5[%c0_1, %c0_2] : memref<128x128xbf16, #tpu.memory_space<vmem>>, vector<128x128xbf16>
    %cst = arith.constant dense<0.000000e+00> : vector<16x128xf32>
    %2 = tpu.matmul %0, %1, %cst {dimension_numbers = #tpu.dot_dimension_numbers<[1], [0], [0], [1], [0, 0, 1, 1], [], []>} : vector<16x128xbf16>, vector<128x128xbf16>, vector<16x128xf32> -> vector<16x128xf32>
    %c0_3 = arith.constant 0 : index
    %c0_4 = arith.constant 0 : index
    %3 = vector.load %arg6[%c0_3, %c0_4] : memref<1x128xf32, #tpu.memory_space<vmem>>, vector<1x128xf32>
    %4 = vector.broadcast %3 : vector<1x128xf32> to vector<16x128xf32>
    %5 = arith.addf %2, %4 : vector<16x128xf32>
    %cst_5 = arith.constant 0.000000e+00 : f32
    %6 = vector.broadcast %cst_5 : f32 to vector<16x128xf32>
    %7 = arith.maximumf %5, %6 : vector<16x128xf32>
    %c0_6 = arith.constant 0 : index
    %c0_7 = arith.constant 0 : index
    %8 = vector.load %arg3[%c0_6, %c0_7] : memref<8x16xf32, #tpu.memory_space<vmem>>, vector<8x16xf32>
    %cst_8 = arith.constant dense<0.000000e+00> : vector<8x128xf32>
    %9 = tpu.matmul %8, %7, %cst_8 {dimension_numbers = #tpu.dot_dimension_numbers<[1], [0], [0], [1], [0, 0, 1, 1], [], []>} : vector<8x16xf32>, vector<16x128xf32>, vector<8x128xf32> -> vector<8x128xf32>
    %c0_9 = arith.constant 0 : index
    %c0_10 = arith.constant 0 : index
    %10 = vector.load %arg7[%c0_9, %c0_10] : memref<128x128xf32, #tpu.memory_space<vmem>>, vector<128x128xf32>
    %cst_11 = arith.constant dense<0.000000e+00> : vector<8x128xf32>
    %11 = tpu.matmul %9, %10, %cst_11 {dimension_numbers = #tpu.dot_dimension_numbers<[1], [0], [0], [1], [0, 0, 1, 1], [], []>} : vector<8x128xf32>, vector<128x128xf32>, vector<8x128xf32> -> vector<8x128xf32>
    %c0_12 = arith.constant 0 : index
    %c0_13 = arith.constant 0 : index
    %12 = vector.load %arg8[%c0_12, %c0_13] : memref<1x128xf32, #tpu.memory_space<vmem>>, vector<1x128xf32>
    %13 = vector.broadcast %12 : vector<1x128xf32> to vector<8x128xf32>
    %14 = arith.addf %11, %13 : vector<8x128xf32>
    %c0_14 = arith.constant 0 : index
    %c0_15 = arith.constant 0 : index
    %15 = vector.load %arg4[%c0_14, %c0_15] : memref<16x8xf32, #tpu.memory_space<vmem>>, vector<16x8xf32>
    %cst_16 = arith.constant dense<0.000000e+00> : vector<16x128xf32>
    %16 = tpu.matmul %15, %14, %cst_16 {dimension_numbers = #tpu.dot_dimension_numbers<[1], [0], [0], [1], [0, 0, 1, 1], [], []>} : vector<16x8xf32>, vector<8x128xf32>, vector<16x128xf32> -> vector<16x128xf32>
    %c0_17 = arith.constant 0 : index
    %c0_18 = arith.constant 0 : index
    %17 = vector.load %arg2[%c0_17, %c0_18] : memref<16x128xbf16, #tpu.memory_space<vmem>>, vector<16x128xbf16>
    %c0_19 = arith.constant 0 : index
    %c0_20 = arith.constant 0 : index
    %18 = vector.load %arg9[%c0_19, %c0_20] : memref<128x128xbf16, #tpu.memory_space<vmem>>, vector<128x128xbf16>
    %cst_21 = arith.constant dense<0.000000e+00> : vector<16x128xf32>
    %19 = tpu.matmul %17, %18, %cst_21 {dimension_numbers = #tpu.dot_dimension_numbers<[1], [0], [0], [1], [0, 0, 1, 1], [], []>} : vector<16x128xbf16>, vector<128x128xbf16>, vector<16x128xf32> -> vector<16x128xf32>
    %20 = arith.addf %19, %16 : vector<16x128xf32>
    %c0_22 = arith.constant 0 : index
    %c0_23 = arith.constant 0 : index
    %21 = vector.load %arg10[%c0_22, %c0_23] : memref<1x128xf32, #tpu.memory_space<vmem>>, vector<1x128xf32>
    %22 = vector.broadcast %21 : vector<1x128xf32> to vector<16x128xf32>
    %23 = arith.addf %20, %22 : vector<16x128xf32>
    %cst_24 = arith.constant 0.000000e+00 : f32
    %24 = vector.broadcast %cst_24 : f32 to vector<16x128xf32>
    %25 = arith.maximumf %23, %24 : vector<16x128xf32>
    %26 = arith.truncf %25 : vector<16x128xf32> to vector<16x128xbf16>
    %c0_25 = arith.constant 0 : index
    %c0_26 = arith.constant 0 : index
    %27 = vector.load %arg11[%c0_25, %c0_26] : memref<128x128xbf16, #tpu.memory_space<vmem>>, vector<128x128xbf16>
    %cst_27 = arith.constant dense<0.000000e+00> : vector<16x128xf32>
    %28 = tpu.matmul %26, %27, %cst_27 {dimension_numbers = #tpu.dot_dimension_numbers<[1], [0], [0], [1], [0, 0, 1, 1], [], []>} : vector<16x128xbf16>, vector<128x128xbf16>, vector<16x128xf32> -> vector<16x128xf32>
    %c0_28 = arith.constant 0 : index
    %c0_29 = arith.constant 0 : index
    %29 = vector.load %arg12[%c0_28, %c0_29] : memref<1x128xf32, #tpu.memory_space<vmem>>, vector<1x128xf32>
    %30 = vector.broadcast %29 : vector<1x128xf32> to vector<16x128xf32>
    %31 = arith.addf %28, %30 : vector<16x128xf32>
    %c0_30 = arith.constant 0 : index
    %c0_31 = arith.constant 0 : index
    %32 = vector.load %arg13[%c0_30, %c0_31] : memref<16x128xf32, #tpu.memory_space<vmem>>, vector<16x128xf32>
    tpu.vector_store %arg13[%c0_30, %c0_31], %31 {strides = array<i32>} : memref<16x128xf32, #tpu.memory_space<vmem>>, vector<16x128xf32>,
    return
  }
  func.func @transform_0(%arg0: i32) -> (i32, i32) {
    %c0_i32 = arith.constant 0 : i32
    %c0_i32_0 = arith.constant 0 : i32
    return %arg0, %c0_i32 : i32, i32
  }
  func.func @transform_1(%arg0: i32) -> (i32, i32) {
    %c0_i32 = arith.constant 0 : i32
    %c0_i32_0 = arith.constant 0 : i32
    return %arg0, %c0_i32 : i32, i32
  }
  func.func @transform_2(%arg0: i32) -> (i32, i32) {
    %c0_i32 = arith.constant 0 : i32
    %c0_i32_0 = arith.constant 0 : i32
    %c0_i32_1 = arith.constant 0 : i32
    return %c0_i32, %c0_i32_0 : i32, i32
  }
  func.func @transform_3(%arg0: i32) -> (i32, i32) {
    %c0_i32 = arith.constant 0 : i32
    %c0_i32_0 = arith.constant 0 : i32
    %c0_i32_1 = arith.constant 0 : i32
    return %c0_i32, %c0_i32_0 : i32, i32
  }
  func.func @transform_4(%arg0: i32) -> (i32, i32) {
    %c0_i32 = arith.constant 0 : i32
    %c0_i32_0 = arith.constant 0 : i32
    %c0_i32_1 = arith.constant 0 : i32
    return %c0_i32, %c0_i32_0 : i32, i32
  }
  func.func @transform_5(%arg0: i32) -> (i32, i32) {
    %c0_i32 = arith.constant 0 : i32
    %c0_i32_0 = arith.constant 0 : i32
    %c0_i32_1 = arith.constant 0 : i32
    return %c0_i32, %c0_i32_0 : i32, i32
  }
  func.func @transform_6(%arg0: i32) -> (i32, i32) {
    %c0_i32 = arith.constant 0 : i32
    %c0_i32_0 = arith.constant 0 : i32
    %c0_i32_1 = arith.constant 0 : i32
    return %c0_i32, %c0_i32_0 : i32, i32
  }
  func.func @transform_7(%arg0: i32) -> (i32, i32) {
    %c0_i32 = arith.constant 0 : i32
    %c0_i32_0 = arith.constant 0 : i32
    %c0_i32_1 = arith.constant 0 : i32
    return %c0_i32, %c0_i32_0 : i32, i32
  }
  func.func @transform_8(%arg0: i32) -> (i32, i32) {
    %c0_i32 = arith.constant 0 : i32
    %c0_i32_0 = arith.constant 0 : i32
    %c0_i32_1 = arith.constant 0 : i32
    return %c0_i32, %c0_i32_0 : i32, i32
  }
  func.func @transform_9(%arg0: i32) -> (i32, i32) {
    %c0_i32 = arith.constant 0 : i32
    %c0_i32_0 = arith.constant 0 : i32
    %c0_i32_1 = arith.constant 0 : i32
    return %c0_i32, %c0_i32_0 : i32, i32
  }
  func.func @transform_10(%arg0: i32) -> (i32, i32) {
    %c0_i32 = arith.constant 0 : i32
    %c0_i32_0 = arith.constant 0 : i32
    %c0_i32_1 = arith.constant 0 : i32
    return %c0_i32, %c0_i32_0 : i32, i32
  }
  func.func @transform_11(%arg0: i32) -> (i32, i32) {
    %c0_i32 = arith.constant 0 : i32
    %c0_i32_0 = arith.constant 0 : i32
    %c0_i32_1 = arith.constant 0 : i32
    return %c0_i32, %c0_i32_0 : i32, i32
  }
  func.func @transform_12(%arg0: i32) -> (i32, i32) {
    %c0_i32 = arith.constant 0 : i32
    %c0_i32_0 = arith.constant 0 : i32
    return %arg0, %c0_i32 : i32, i32
  }
}

</mosaic_0001>

<bundles_post_ra>
// kernel: tpu_custom_call.1
= control target key start
LH: loop header
LB: loop body
LE: loop exit
PB: predicated region body
PF: predicated region fallthrough
CT: control target
= control target key end

     0   :  { %17 = vsyncpa [#allocation3], 0  ;;  %s1241_s0 = inlined_call_operand.vmem [shape: bf16[16,128], index: 0, kind: input, shape index: {}]   ;;  %s1242_s1 = inlined_call_operand.vmem [shape: bf16[16,128], index: 1, kind: input, shape index: {}]   ;;  %s1243_s2 = inlined_call_operand.vmem [shape: f32[8,16], index: 2, kind: input, shape index: {}]   ;;  %s1244_s3 = inlined_call_operand.vmem [shape: f32[16,8], index: 3, kind: input, shape index: {}]   ;;  %s1245_s4 = inlined_call_operand.hbm [shape: bf16[128,128], index: 4, kind: input, shape index: {}]   ;;  %s1246_s5 = inlined_call_operand.vmem [shape: f32[1,128], index: 5, kind: input, shape index: {}]   ;;  %s1247_s6 = inlined_call_operand.hbm [shape: f32[128,128], index: 6, kind: input, shape index: {}]   ;;  %s1248_s7 = inlined_call_operand.vmem [shape: f32[1,128], index: 7, kind: input, shape index: {}]   ;;  %s1249_s8 = inlined_call_operand.hbm [shape: bf16[128,128], index: 8, kind: input, shape index: {}]   ;;  %s1250_s9 = inlined_call_operand.vmem [shape: f32[1,128], index: 9, kind: input, shape index: {}]   ;;  %s1251_s10 = inlined_call_operand.hbm [shape: bf16[128,128], index: 10, kind: input, shape index: {}]   ;;  %s1252_s11 = inlined_call_operand.vmem [shape: f32[1,128], index: 11, kind: input, shape index: {}]   ;;  %s1253_s12 = inlined_call_operand.hbm [shape: f32[16,128], index: 12, kind: output, shape index: {}]  }
   0x1   :  { %18 = vsyncpa [#allocation6], 0 }
   0x2   :  { %19 = vsyncpa [#allocation9], 0 }
   0x3   :  { %20 = vsyncpa [#allocation4], 0  ;;  %s1065_s21 = smov [#allocation5]  }
   0x4   :  { %s48_s22 = sshll.u32 %s1065_s21, 4  ;;  %s49_s22 = int_to_ptr.vmem [resolvable:$true] %s48_s22 }
   0x5   :  { %s965_s23 = scalar_lea.vmem %s49_s22, 2048  ;;  %p970_p1 = scmp.lt.s32.totalorder %s49_s22, %s49_s22 }
   0x6   :  { %p966_p0 = scmp.ne.s32.totalorder %s49_s22, %s965_s23  ;;  %p971_p2 = scmp.lt.s32.totalorder %s965_s23, %s965_s23 }
   0x8   :  { %p972_p3 = por %p971_p2, %p970_p1 }
   0xa   :  { %p973_p4 = pnand %p972_p3, %p966_p0 }
   0xc   :  { %976 = shalt.err (!%p973_p4)
}
   0xd   :  { %s1066_s24 = smov 128   ;;  %s1067_s25 = smov 8  }
   0xe   :  { %54 = dma.hbm_to_vmem [thread:$0]  %s1247_s6, 2048, %s49_s22, [#allocation6], %s1066_s24, %s1066_s24, %s1067_s25  }
   0xf   :  { %s1068_s28 = smov [#allocation2]  }
  0x10   :  { %s34_s29 = sshll.u32 %s1068_s28, 4  ;;  %s35_s29 = int_to_ptr.vmem [resolvable:$true] %s34_s29 }
  0x11   :  { %s985_s30 = scalar_lea.vmem %s35_s29, 1024  ;;  %p990_p6 = scmp.lt.s32.totalorder %s35_s29, %s35_s29 }
  0x12   :  { %p986_p5 = scmp.ne.s32.totalorder %s35_s29, %s985_s30  ;;  %p991_p7 = scmp.lt.s32.totalorder %s985_s30, %s985_s30 }
  0x14   :  { %p992_p8 = por %p991_p7, %p990_p6 }
  0x16   :  { %p993_p9 = pnand %p992_p8, %p986_p5 }
  0x18   :  { %996 = shalt.err (!%p993_p9)
}
  0x19   :  { %s1069_s13 = smov 64   ;;  %s1070_s14 = smov 4  }
  0x1a   :  { %40 = dma.hbm_to_vmem [thread:$0]  %s1245_s4, 1024, %s35_s29, [#allocation3], %s1069_s13, %s1069_s13, %s1070_s14  }
  0x1b   :  { %s1071_s17 = smov [#allocation7]   ;;  %s1072_s19 = smov [#allocation8]  }
  0x1c   :  { %s62_s18 = sshll.u32 %s1071_s17, 4  ;;  %s76_s6 = sshll.u32 %s1072_s19, 4  ;;  %s63_s18 = int_to_ptr.vmem [resolvable:$true] %s62_s18  ;;  %s77_s6 = int_to_ptr.vmem [resolvable:$true] %s76_s6 }
  0x1d   :  { %s1005_s20 = scalar_lea.vmem %s63_s18, 1024  ;;  %p1010_p11 = scmp.lt.s32.totalorder %s63_s18, %s63_s18 }
  0x1e   :  { %p1006_p10 = scmp.ne.s32.totalorder %s63_s18, %s1005_s20  ;;  %p1011_p12 = scmp.lt.s32.totalorder %s1005_s20, %s1005_s20 }
  0x20   :  { %p1012_p13 = por %p1011_p12, %p1010_p11 }
  0x22   :  { %p1013_p0 = pnand %p1012_p13, %p1006_p10 }
  0x24   :  { %1016 = shalt.err (!%p1013_p0)
}
  0x25   :  { %68 = dma.hbm_to_vmem [thread:$0]  %s1249_s8, 1024, %s63_s18, [#allocation6], %s1069_s13, %s1069_s13, %s1070_s14  }
  0x26   :  { %s1025_s23 = scalar_lea.vmem %s77_s6, 1024  ;;  %p1030_p2 = scmp.lt.s32.totalorder %s77_s6, %s77_s6 }
  0x27   :  { %p1026_p1 = scmp.ne.s32.totalorder %s77_s6, %s1025_s23  ;;  %p1031_p3 = scmp.lt.s32.totalorder %s1025_s23, %s1025_s23 }
  0x29   :  { %p1032_p4 = por %p1031_p3, %p1030_p2 }
  0x2b   :  { %p1033_p5 = pnand %p1032_p4, %p1026_p1 }
  0x2d   :  { %1036 = shalt.err (!%p1033_p5)
}
  0x2e   :  { %82 = dma.hbm_to_vmem [thread:$0]  %s1251_s10, 1024, %s77_s6, [#allocation9], %s1069_s13, %s1069_s13, %s1070_s14  }
  0x2f   :  { %1057 = dma.done.wait [#allocation3], 1024  }
  0x30   :  { %1058 = vsyncadd [#allocation3], 4294966272 }
  0x31   :  { %1059 = dma.done.wait [#allocation6], 3072  }
  0x32   :  { %1060 = vsyncadd [#allocation6], 4294964224 }
  0x33   :  { %1061 = dma.done.wait [#allocation9], 1024  }
  0x34   :  { %1062 = vsyncadd [#allocation9], 4294966272  ;;  %v1073_v0 = vmov 0.0   ;;  %vm1074_vm0 = vmmov 0   ;;  %v931_v1 = vld [vmem:[#allocation2 + $0x38] sm:$0xff]   ;;  %v932_v2 = vld [vmem:[#allocation2 + $0x30] sm:$0xff]  }
  0x35   :  { %813 = vmatprep.subr.bf16.mxu0 %v1073_v0  ;;  %829 = vmatprep.mubr.msk.bf16.mxu0 %vm1074_vm0, %v1073_v0  ;;  %v933_v3 = vld [vmem:[#allocation2 + $0x28] sm:$0xff]   ;;  %v934_v4 = vld [vmem:[#allocation2 + $0x20] sm:$0xff]   ;;  %v935_v5 = vld [vmem:[#allocation2 + $0x18] sm:$0xff]   ;;  %vm221_vm1 = vcmask 130048   ;;  %vm390_vm2 = vcmask 64512   ;;  %s1075_s19 = smov [#allocation10]  }
  0x36   :  { %833 = vmatprep.subr.mxu1 %v1073_v0  ;;  %837 = vmatprep.mubr.msk.f32.mxu1 %vm1074_vm0, %v1073_v0  ;;  %v936_v6 = vld [vmem:[#allocation2 + $0x10] sm:$0xff]   ;;  %v937_v7 = vld [vmem:[#allocation2 + $0x8] sm:$0xff]   ;;  %v938_v8 = vld [vmem:[#allocation2] sm:$0xff]   ;;  %s716_s6 = sshll.u32 %s1075_s19, 4  ;;  %s717_s6 = int_to_ptr.vmem [resolvable:$true] %s716_s6 }
  0x37   :  { %814 = vmatpush3.bf16.msra.mxu0 %v931_v1  ;;  %v939_v9 = vld [vmem:[%s1241_s0] sm:$0xff]   ;;  %v310_v20 = vld [vmem:[#allocation5 + $0x78] sm:$0xff]  ;;  %v309_v21 = vld [vmem:[#allocation5 + $0x70] sm:$0xff]  ;;  %p1042_p7 = scmp.lt.s32.totalorder %s717_s6, %s717_s6 }
  0x38   :  { %815 = vmatprep.subr.bf16.mxu0 %v1073_v0  ;;  %v730_v11 = vld [vmem:[%s1246_s5] ss:$0 sm:$0xff]  ;;  %v308_v22 = vld [vmem:[#allocation5 + $0x68] sm:$0xff]  ;;  %v306_v24 = vld [vmem:[#allocation5 + $0x58] sm:$0xff] }
  0x39   :  { %v220_v19 = vld [vmem:[%s1243_s2] sm:$0xff]  ;;  %v305_v25 = vld [vmem:[#allocation5 + $0x50] sm:$0xff]  ;;  %v304_v26 = vld [vmem:[#allocation5 + $0x48] sm:$0xff] }
  0x3a   :  { %v307_v23 = vld [vmem:[#allocation5 + $0x60] sm:$0xff]  ;;  %v302_v28 = vld [vmem:[#allocation5 + $0x38] sm:$0xff]  ;;  %v301_v29 = vld [vmem:[#allocation5 + $0x30] sm:$0xff] }
  0x3b   :  { %816 = vmatpush3.bf16.msra.mxu0 %v932_v2  ;;  %v303_v27 = vld [vmem:[#allocation5 + $0x40] sm:$0xff]  ;;  %v300_v30 = vld [vmem:[#allocation5 + $0x28] sm:$0xff]  ;;  %v298_v32 = vld [vmem:[#allocation5 + $0x18] sm:$0xff] }
  0x3c   :  { %817 = vmatprep.subr.bf16.mxu0 %v1073_v0  ;;  %v299_v31 = vld [vmem:[#allocation5 + $0x20] sm:$0xff]  ;;  %v297_v33 = vld [vmem:[#allocation5 + $0x10] sm:$0xff]  ;;  %v296_v34 = vld [vmem:[#allocation5 + $0x8] sm:$0xff] }
  0x3d   :  { %v295_v35 = vld [vmem:[#allocation5] sm:$0xff]  ;;  %v940_v36 = vld [vmem:[#allocation7 + $0x38] sm:$0xff]   ;;  %v941_v39 = vld [vmem:[#allocation7 + $0x30] sm:$0xff]  }
  0x3e   :  { %v942_v40 = vld [vmem:[#allocation7 + $0x28] sm:$0xff]   ;;  %v943_v41 = vld [vmem:[#allocation7 + $0x20] sm:$0xff]   ;;  %v944_v42 = vld [vmem:[#allocation7 + $0x18] sm:$0xff]  }
  0x3f   :  { %818 = vmatpush3.bf16.msra.mxu0 %v933_v3  ;;  %v945_v43 = vld [vmem:[#allocation7 + $0x10] sm:$0xff]   ;;  %v946_v44 = vld [vmem:[#allocation7 + $0x8] sm:$0xff]   ;;  %v947_v45 = vld [vmem:[#allocation7] sm:$0xff]  }
  0x40   :  { %819 = vmatprep.subr.bf16.mxu0 %v1073_v0  ;;  %v948_v46 = vld [vmem:[%s1242_s1] sm:$0xff]   ;;  %v389_v52 = vld [vmem:[%s1244_s3 + $0x8] sm:$0xff]  ;;  %v949_v53 = vld [vmem:[#allocation8 + $0x38] sm:$0xff]  }
  0x41   :  { %v388_v47 = vld [vmem:[%s1244_s3] sm:$0xff]  ;;  %v950_v54 = vld [vmem:[#allocation8 + $0x30] sm:$0xff]   ;;  %v951_v55 = vld [vmem:[#allocation8 + $0x28] sm:$0xff]  }
  0x42   :  { %v741_v48 = vld [vmem:[%s1248_s7] ss:$0 sm:$0xff]  ;;  %v953_v57 = vld [vmem:[#allocation8 + $0x18] sm:$0xff]   ;;  %v954_v61 = vld [vmem:[#allocation8 + $0x10] sm:$0xff]  }
  0x43   :  { %820 = vmatpush3.bf16.msra.mxu0 %v934_v4  ;;  %v952_v56 = vld [vmem:[#allocation8 + $0x20] sm:$0xff]   ;;  %v955_v63 = vld [vmem:[#allocation8 + $0x8] sm:$0xff]  }
  0x44   :  { %821 = vmatprep.subr.bf16.mxu0 %v1073_v0  ;;  %v956_v1 = vld [vmem:[#allocation8] sm:$0xff]  }
  0x45   :  { %v753_v3 = vld [vmem:[%s1250_s9] ss:$0 sm:$0xff]  ;;  %s1037_s9 = scalar_lea.vmem %s717_s6, 256 }
  0x46   :  { %p1038_p6 = scmp.ne.s32.totalorder %s717_s6, %s1037_s9  ;;  %p1043_p8 = scmp.lt.s32.totalorder %s1037_s9, %s1037_s9 }
  0x47   :  { %822 = vmatpush3.bf16.msra.mxu0 %v935_v5 }
  0x48   :  { %823 = vmatprep.subr.bf16.mxu0 %v1073_v0  ;;  %p1044_p9 = por %p1043_p8, %p1042_p7 }
  0x4a   :  { %p1045_p10 = pnand %p1044_p9, %p1038_p6 }
  0x4b   :  { %824 = vmatpush3.bf16.msra.mxu0 %v936_v6 }
  0x4c   :  { %825 = vmatprep.subr.bf16.mxu0 %v1073_v0 }
  0x4f   :  { %826 = vmatpush3.bf16.msra.mxu0 %v937_v7 }
  0x50   :  { %827 = vmatprep.subr.bf16.mxu0 %v1073_v0 }
  0x53   :  { %828 = vmatpush3.bf16.msra.mxu0 %v938_v8 }
  0x56   :  { %830 = vmatmul.mubr.bf16.vlgmr.msra.gmra.mxu0 %v939_v9 }
  0x57   :  { %877 = vmatprep.mubr.msk.f32.mxu0 %vm390_vm2, %v388_v47 }
 0x116   :  { %v211_v10 = vpop.f32.mrf.mxu0 }
 0x117   :  { %v212_v14 = vadd.f32 %v730_v11, %v211_v10 }
 0x118   :  { %v831_v12 = vpop.f32.mrf.mxu0 }
 0x119   :  { %v218_v18 = vmax.f32 %v212_v14, 0.0 }
 0x11a   :  { %v214_v13 = vpop.f32.mrf.mxu0 }
 0x11b   :  { %v215_v15 = vadd.f32 %v730_v11, %v214_v13 }
 0x11c   :  { %v832_v16 = vpop.f32.mrf.mxu0 }
 0x11d   :  { %v219_v17 = vmax.f32 %v215_v15, 0.0 }
 0x11f   :  { %834 = vmatpush3.msra.mxu1 %v219_v17 }
 0x120   :  { %835 = vmatprep.subr.mxu1 %v1073_v0 }
 0x121   :  { %836 = vmatpush3.msra.mxu1 %v218_v18 }
 0x122   :  { %838 = vmatmul.mubr.msk.f32.vlgmr.msra.gmra.mxu1 %vm221_vm1, %v220_v19  ;;  %840 = vmatprep.subr.mxu1 %v1073_v0 }
 0x123   :  { %841 = vmatpush3.msra.mxu1 %v310_v20  ;;  %872 = vmatprep.mubr.msk.f32.mxu1 %vm1074_vm0, %v1073_v0 }
 0x124   :  { %842 = vmatprep.subr.mxu1 %v1073_v0 }
 0x125   :  { %843 = vmatpush3.msra.mxu1 %v309_v21 }
 0x126   :  { %844 = vmatprep.subr.mxu1 %v1073_v0 }
 0x127   :  { %845 = vmatpush3.msra.mxu1 %v308_v22 }
 0x128   :  { %846 = vmatprep.subr.mxu1 %v1073_v0 }
 0x129   :  { %847 = vmatpush3.msra.mxu1 %v307_v23 }
 0x12a   :  { %848 = vmatprep.subr.mxu1 %v1073_v0 }
 0x12b   :  { %849 = vmatpush3.msra.mxu1 %v306_v24 }
 0x12c   :  { %850 = vmatprep.subr.mxu1 %v1073_v0 }
 0x12d   :  { %851 = vmatpush3.msra.mxu1 %v305_v25 }
 0x12e   :  { %852 = vmatprep.subr.mxu1 %v1073_v0 }
 0x12f   :  { %853 = vmatpush3.msra.mxu1 %v304_v26 }
 0x130   :  { %854 = vmatprep.subr.mxu1 %v1073_v0 }
 0x131   :  { %855 = vmatpush3.msra.mxu1 %v303_v27 }
 0x132   :  { %856 = vmatprep.subr.mxu1 %v1073_v0 }
 0x133   :  { %857 = vmatpush3.msra.mxu1 %v302_v28 }
 0x134   :  { %858 = vmatprep.subr.mxu1 %v1073_v0 }
 0x135   :  { %859 = vmatpush3.msra.mxu1 %v301_v29 }
 0x136   :  { %860 = vmatprep.subr.mxu1 %v1073_v0 }
 0x137   :  { %861 = vmatpush3.msra.mxu1 %v300_v30 }
 0x138   :  { %862 = vmatprep.subr.mxu1 %v1073_v0 }
 0x139   :  { %863 = vmatpush3.msra.mxu1 %v299_v31 }
 0x13a   :  { %864 = vmatprep.subr.mxu1 %v1073_v0 }
 0x13b   :  { %865 = vmatpush3.msra.mxu1 %v298_v32 }
 0x13c   :  { %866 = vmatprep.subr.mxu1 %v1073_v0 }
 0x13d   :  { %867 = vmatpush3.msra.mxu1 %v297_v33 }
 0x13e   :  { %868 = vmatprep.subr.mxu1 %v1073_v0 }
 0x13f   :  { %869 = vmatpush3.msra.mxu1 %v296_v34 }
 0x140   :  { %870 = vmatprep.subr.mxu1 %v1073_v0 }
 0x141   :  { %871 = vmatpush3.msra.mxu1 %v295_v35 }
 0x142   :  { %880 = vmatprep.subr.bf16.mxu1 %v1073_v0 }
 0x1e2   :  { %v291_v37 = vpop.f32.mrf.mxu1 }
 0x1e3   :  { %873 = vmatmul.mubr.f32.vlgmr.msra.gmra.mxu1 %v291_v37 }
 0x1e4   :  { %v839_v38 = vpop.f32.mrf.mxu1  ;;  %881 = vmatpush3.bf16.msra.mxu1 %v940_v36  ;;  %896 = vmatprep.mubr.msk.bf16.mxu1 %vm1074_vm0, %v1073_v0 }
 0x1e5   :  { %882 = vmatprep.subr.bf16.mxu1 %v1073_v0 }
 0x1e8   :  { %883 = vmatpush3.bf16.msra.mxu1 %v941_v39 }
 0x1e9   :  { %884 = vmatprep.subr.bf16.mxu1 %v1073_v0 }
 0x1ec   :  { %885 = vmatpush3.bf16.msra.mxu1 %v942_v40 }
 0x1ed   :  { %886 = vmatprep.subr.bf16.mxu1 %v1073_v0 }
 0x1f0   :  { %887 = vmatpush3.bf16.msra.mxu1 %v943_v41 }
 0x1f1   :  { %888 = vmatprep.subr.bf16.mxu1 %v1073_v0 }
 0x1f4   :  { %889 = vmatpush3.bf16.msra.mxu1 %v944_v42 }
 0x1f5   :  { %890 = vmatprep.subr.bf16.mxu1 %v1073_v0 }
 0x1f8   :  { %891 = vmatpush3.bf16.msra.mxu1 %v945_v43 }
 0x1f9   :  { %892 = vmatprep.subr.bf16.mxu1 %v1073_v0 }
 0x1fc   :  { %893 = vmatpush3.bf16.msra.mxu1 %v946_v44 }
 0x1fd   :  { %894 = vmatprep.subr.bf16.mxu1 %v1073_v0 }
 0x200   :  { %895 = vmatpush3.bf16.msra.mxu1 %v947_v45 }
 0x203   :  { %897 = vmatmul.mubr.bf16.vlgmr.msra.gmra.mxu1 %v948_v46 }
 0x2a3   :  { %v384_v49 = vpop.f32.mrf.mxu1 }
 0x2a4   :  { %v385_v50 = vadd.f32 %v741_v48, %v384_v49 }
 0x2a5   :  { %v874_v51 = vpop.f32.mrf.mxu1 }
 0x2a6   :  { %875 = vmatprep.subr.mxu0 %v385_v50 }
 0x2a7   :  { %876 = vmatpush3.msra.mxu0 %v385_v50 }
 0x2a8   :  { %878 = vmatmul.mubr.msk.f32.vlgmr.msra.gmra.mxu0 %vm390_vm2, %v389_v52  ;;  %900 = vmatprep.subr.bf16.mxu0 %v1073_v0 }
 0x2a9   :  { %901 = vmatpush3.bf16.msra.mxu0 %v949_v53  ;;  %916 = vmatprep.mubr.msk.bf16.mxu0 %vm1074_vm0, %v1073_v0 }
 0x2aa   :  { %902 = vmatprep.subr.bf16.mxu0 %v1073_v0 }
 0x2ad   :  { %903 = vmatpush3.bf16.msra.mxu0 %v950_v54 }
 0x2ae   :  { %904 = vmatprep.subr.bf16.mxu0 %v1073_v0 }
 0x2b1   :  { %905 = vmatpush3.bf16.msra.mxu0 %v951_v55 }
 0x2b2   :  { %906 = vmatprep.subr.bf16.mxu0 %v1073_v0 }
 0x2b5   :  { %907 = vmatpush3.bf16.msra.mxu0 %v952_v56 }
 0x2b6   :  { %908 = vmatprep.subr.bf16.mxu0 %v1073_v0 }
 0x2b9   :  { %909 = vmatpush3.bf16.msra.mxu0 %v953_v57 }
 0x2ba   :  { %910 = vmatprep.subr.bf16.mxu0 %v1073_v0 }
 0x2bd   :  { %911 = vmatpush3.bf16.msra.mxu0 %v954_v61 }
 0x2be   :  { %912 = vmatprep.subr.bf16.mxu0 %v1073_v0 }
 0x2c1   :  { %913 = vmatpush3.bf16.msra.mxu0 %v955_v63 }
 0x2c2   :  { %914 = vmatprep.subr.bf16.mxu0 %v1073_v0  ;;  %v754_v0 = vld [vmem:[%s1252_s11] ss:$0 sm:$0xff] }
 0x2c3   :  { %v578_v58 = vpop.f32.mrf.mxu1 }
 0x2c5   :  { %v898_v59 = vpop.f32.mrf.mxu1  ;;  %915 = vmatpush3.bf16.msra.mxu0 %v956_v1 }
 0x2c7   :  { %v581_v60 = vpop.f32.mrf.mxu1 }
 0x2c9   :  { %v899_v62 = vpop.f32.mrf.mxu1 }
 0x368   :  { %v879_v2 = vpop.f32.mrf.mxu0 }
 0x369   :  { %v582_v4 = vadd.f32 %v879_v2, %v581_v60 }
 0x36a   :  { %v463_v5 = vpop.f32.mrf.mxu0 }
 0x36b   :  { %v579_v6 = vadd.f32 %v578_v58, %v463_v5  ;;  %v593_v7 = vadd.f32 %v753_v3, %v582_v4 }
 0x36d   :  { %v592_v8 = vadd.f32 %v753_v3, %v579_v6  ;;  %v595_v10 = vmax.f32 %v593_v7, 0.0 }
 0x36f   :  { %v594_v9 = vmax.f32 %v592_v8, 0.0 }
 0x371   :  { %v596_v11 = vpack.c.bf16 %v595_v10, %v594_v9 }
 0x373   :  { %917 = vmatmul.mubr.bf16.vlgmr.msra.gmra.mxu0 %v596_v11 }
 0x433   :  { %v702_v12 = vpop.f32.mrf.mxu0 }
 0x434   :  { %v703_v13 = vadd.f32 %v754_v0, %v702_v12 }
 0x435   :  { %v918_v14 = vpop.f32.mrf.mxu0 }
 0x436   :  { %709 = vst [vmem:[#allocation10] sm:$0xff] %v703_v13 }
 0x437   :  { %v705_v15 = vpop.f32.mrf.mxu0 }
 0x438   :  { %v706_v16 = vadd.f32 %v754_v0, %v705_v15 }
 0x439   :  { %v919_v17 = vpop.f32.mrf.mxu0 }
 0x43a   :  { %710 = vst [vmem:[#allocation10 + $0x8] sm:$0xff] %v706_v16 }
 0x43b   :  { %1048 = shalt.err (!%p1045_p10)
}
 0x43c   :  { %722 = dma.vmem_to_hbm [thread:$0]  %s717_s6, 256, %s1253_s12, [#allocation4], %s1066_s24, %s1066_s24, %s1067_s25  }
 0x43d   :  { %1063 = dma.done.wait [#allocation4], 256  }
 0x43e   :  { %1064 = vsyncadd [#allocation4], 4294967040 }
 0x43f   :  { %726 = vsyncpa [#allocation3], 1 }
 0x440   :  { %727 = vsyncpa [#allocation6], 1 }
 0x441   :  { %728 = vsyncpa [#allocation9], 1 }
 0x442   :  { %729 = vsyncpa [#allocation4], 1 }

</bundles_post_ra>
